<compile_context>
chip_gen: v6e
topology: v6e:2x2x1
jax: 0.10.0
libtpu: 0.0.40
codegen_flags: <defaults>
</compile_context>

<pallas_src>
import math
import functools

import jax
import jax.numpy as jnp
from jax import lax
from jax.experimental import pallas as pl
from jax.experimental.pallas import tpu as pltpu

_INT32_MIN = -(2 ** 31)
_GOLDEN_U32 = 0x9E3779B9


# -----------------------------------------------------------------------------
# Buffer setup (plain JAX glue; identical math to PositionalEncoding.__init__)
# -----------------------------------------------------------------------------
def make_pe_table(d_model: int, max_len: int) -> jnp.ndarray:
    position = jnp.arange(max_len, dtype=jnp.float32)[:, None]            # (max_len, 1)
    div_term = jnp.exp(
        jnp.arange(0, d_model, 2, dtype=jnp.float32) * (-math.log(10000.0) / d_model)
    )                                                                      # (d_model/2,)
    pe = jnp.zeros((max_len, d_model), dtype=jnp.float32)
    pe = pe.at[:, 0::2].set(jnp.sin(position * div_term))
    pe = pe.at[:, 1::2].set(jnp.cos(position * div_term))
    return pe                                                              # (max_len, d_model)


# -----------------------------------------------------------------------------
# Kernel
# -----------------------------------------------------------------------------
def _fmix32(x):
    """murmur3 finalizer on int32 bit patterns.

    Logical right-shifts are emulated with (arith-shift & mask); multiplies wrap
    mod 2^32 (two's-complement), so this matches the u32 reference bit-for-bit.
    Pure VPU int ops: lowers on Mosaic and in interpret mode.
    """
    x = x ^ ((x >> 16) & jnp.int32(0xFFFF))
    x = x * jnp.int32(-2048144789)            # 0x85EBCA6B
    x = x ^ ((x >> 13) & jnp.int32(0x7FFFF))
    x = x * jnp.int32(-1028477387)            # 0xC2B2AE35
    x = x ^ ((x >> 16) & jnp.int32(0xFFFF))
    return x


def _pe_kernel(x_ref, pe_ref, o_ref, *, bcast_pe, drop_cfg):
    """out = dropout(x + pe).  drop_cfg=None -> eval (identity dropout)."""
    pe = pe_ref[...]
    if bcast_pe:                               # pe: (rows, D) broadcast over batch
        pe = pe[:, None, :]
    y = x_ref[...] + pe

    if drop_cfg is None:                       # eval mode: exact x + pe
        o_ref[...] = y
        return

    thr_i32, scale, seed_mix = drop_cfg
    shape = y.shape
    nelem = 1
    for s in shape:
        nelem *= s
    # Unique per-element counter: flat index within block + per-block offset.
    strides = pl.strides_from_shape(shape)
    flat = lax.broadcasted_iota(jnp.int32, shape, 0) * jnp.int32(strides[0])
    for ax in range(1, len(shape)):
        flat = flat + lax.broadcasted_iota(jnp.int32, shape, ax) * jnp.int32(strides[ax])
    counter = flat + pl.program_id(0) * jnp.int32(nelem)
    h = _fmix32(counter ^ jnp.int32(seed_mix))
    # unsigned(h) < keep_u32  <=>  (h ^ INT32_MIN) <_signed (keep_u32 - 2^31)
    keep = (h ^ jnp.int32(_INT32_MIN)) < jnp.int32(thr_i32)
    o_ref[...] = jnp.where(keep, y * jnp.asarray(scale, dtype=y.dtype),
                           jnp.zeros_like(y))


# -----------------------------------------------------------------------------
# Tile / VMEM sizing (generation-aware)
# -----------------------------------------------------------------------------
def _vmem_budget_bytes():
    """~75% of physical VMEM: ~96 MiB on v5e/v6e (128 MiB), ~48 MiB on v7x (64 MiB)."""
    try:
        cap = int(pltpu.get_tpu_info().vmem_capacity_bytes)
    except Exception:                          # interpret mode / non-TPU backend
        cap = 128 * 1024 * 1024
    return (3 * cap) // 4


def _pick_rows(total_rows, x_row_bytes, pe_row_bytes, sublane, budget):
    """Row tile: as big as the VMEM budget allows (amortize ~0.35us/step overhead),
    targeting ~16 MiB x-tiles, sublane-aligned on the second-minor axis."""
    per_row = 4 * x_row_bytes + 2 * pe_row_bytes      # dbl-buffered x, out, pe
    rows_vmem = max(1, (budget - (4 << 20)) // per_row)
    rows_tgt = max(1, (16 << 20) // x_row_bytes)
    rows = min(rows_vmem, rows_tgt)
    if rows >= total_rows:
        return total_rows
    rows = max(sublane, rows - rows % sublane)
    return int(min(rows, total_rows))


# -----------------------------------------------------------------------------
# Wrapper
# -----------------------------------------------------------------------------
def positional_encoding(x, pe_table, *, dropout: float = 0.1,
                        training: bool = False, seed: int = 0):
    """x: (S, B, D); pe_table: (max_len, D).  Matches PositionalEncoding.forward."""
    S, B, D = x.shape
    pe_slice = pe_table[:S].astype(x.dtype)           # cast once, not per-tile
    itemsize = jnp.dtype(x.dtype).itemsize
    pack = max(8, 32 // itemsize)                     # sublane pack: 8 f32 / 16 bf16
    budget = _vmem_budget_bytes()

    # Dropout config (static): keep prob threshold in the u32 domain, signed view.
    drop_cfg = None
    if training and dropout > 0.0:
        p = float(dropout)
        if p >= 1.0:
            return jnp.zeros_like(x)                  # nn.Dropout(p=1) drops everything
        keep_u32 = min(max(int(round((1.0 - p) * 4294967296.0)), 1), 4294967295)
        thr_i32 = keep_u32 - 2147483648
        seed_mix = (int(seed) * _GOLDEN_U32 + 0x7F4A7C15) & 0xFFFFFFFF
        if seed_mix >= 2 ** 31:
            seed_mix -= 2 ** 32
        drop_cfg = (thr_i32, 1.0 / (1.0 - p), seed_mix)

    use_3d = (B % pack == 0)                          # batch fills sublanes densely

    if use_3d:
        # (rows, B, D) x/out blocks + (rows, D) pe slab (1/B of the x traffic).
        rows = _pick_rows(S, B * D * itemsize, D * itemsize, 8, budget)
        grid = (pl.cdiv(S, rows),)
        in_specs = [pl.BlockSpec((rows, B, D), lambda i: (i, 0, 0)),
                    pl.BlockSpec((rows, D), lambda i: (i, 0))]
        out_spec = pl.BlockSpec((rows, B, D), lambda i: (i, 0, 0))
        out_shape = jax.ShapeDtypeStruct((S, B, D), x.dtype)
        x_in, pe_in = x, pe_slice
        footprint = rows * (4 * B * D + 2 * D) * itemsize
        bcast = True
    else:
        # Small / unaligned batch: dense 2-D (S*B, D) view keeps sublanes packed;
        # pe is pre-broadcast in the wrapper (extra pe read is acceptable at small B).
        R = S * B
        rows = _pick_rows(R, D * itemsize, D * itemsize, pack, budget)
        grid = (pl.cdiv(R, rows),)
        in_specs = [pl.BlockSpec((rows, D), lambda i: (i, 0)),
                    pl.BlockSpec((rows, D), lambda i: (i, 0))]
        out_spec = pl.BlockSpec((rows, D), lambda i: (i, 0))
        out_shape = jax.ShapeDtypeStruct((R, D), x.dtype)
        x_in = x.reshape(R, D)
        pe_in = jnp.broadcast_to(pe_slice[:, None, :], (S, B, D)).reshape(R, D)
        footprint = rows * 6 * D * itemsize
        bcast = False

    vmem_limit = int(min(budget, max(2 * footprint, 32 * 1024 * 1024)))
    cparams = pltpu.CompilerParams(
        dimension_semantics=("parallel",),
        vmem_limit_bytes=vmem_limit,
    )
    kernel = functools.partial(_pe_kernel, bcast_pe=bcast, drop_cfg=drop_cfg)

    out = pl.pallas_call(
        kernel,
        grid=grid,
        in_specs=in_specs,
        out_specs=out_spec,
        out_shape=out_shape,
        compiler_params=cparams,
    )(x_in, pe_in)

    return out if use_3d else out.reshape(S, B, D)


# -----------------------------------------------------------------------------
# Demo / correctness check
# -----------------------------------------------------------------------------
if __name__ == "__main__":
    key = jax.random.PRNGKey(0)
    S, B, D = 8, 2, 32            # seq=8, batch=2, d_model=32  (small-B / flat path)
    max_len = 64

    x = jax.random.normal(key, (S, B, D), dtype=jnp.float32)
    pe_table = make_pe_table(D, max_len)
    ref = x + pe_table[:S][:, None, :]

    # Eval mode (module.eval(): dropout == identity) — must match exactly.
    out = positional_encoding(x, pe_table, dropout=0.1, training=False)
    out = jax.block_until_ready(out)
    assert out.shape == (S, B, D)
    assert jnp.allclose(out, ref, atol=1e-6, rtol=1e-6)

    # Training mode: every element is either dropped (0) or kept & scaled by 1/(1-p).
    p = 0.5
    out_tr = positional_encoding(x, pe_table, dropout=p, training=True, seed=123)
    out_tr = jax.block_until_ready(out_tr)
    kept = ref / (1.0 - p)
    structural_ok = (jnp.isclose(out_tr, 0.0, atol=1e-6)
                     | jnp.isclose(out_tr, kept, atol=1e-5, rtol=1e-5))
    assert out_tr.shape == (S, B, D)
    assert bool(jnp.all(structural_ok))

    # Also exercise the sublane-dense 3-D path (B aligned to the f32 pack of 8).
    S2, B2, D2 = 8, 8, 128
    x2 = jax.random.normal(jax.random.PRNGKey(1), (S2, B2, D2), dtype=jnp.float32)
    pe2 = make_pe_table(D2, 32)
    ref2 = x2 + pe2[:S2][:, None, :]
    out2 = jax.block_until_ready(positional_encoding(x2, pe2, training=False))
    assert out2.shape == (S2, B2, D2)
    assert jnp.allclose(out2, ref2, atol=1e-6, rtol=1e-6)

    print("KERNEL_OK")
</pallas_src>

<mosaic_0001>
module attributes {stable_mosaic.version = 11 : i64} {
  func.func @_pe_kernel(%arg0: i32, %arg1: memref<16x32xf32, #tpu.memory_space<vmem>>, %arg2: memref<16x32xf32, #tpu.memory_space<vmem>>, %arg3: memref<16x32xf32, #tpu.memory_space<vmem>>) attributes {dimension_semantics = [#tpu.dimension_semantics<parallel>], iteration_bounds = array<i64: 1>, scalar_prefetch = 0 : i64, scratch_operands = 0 : i64, tpu.core_type = #tpu.core_type<tc>, window_params = [{transform_indices = @transform_0, window_bounds = array<i64: 16, 32>}, {transform_indices = @transform_1, window_bounds = array<i64: 16, 32>}, {transform_indices = @transform_2, window_bounds = array<i64: 16, 32>}]} {
    %c0 = arith.constant 0 : index
    %c0_0 = arith.constant 0 : index
    %0 = vector.load %arg2[%c0, %c0_0] : memref<16x32xf32, #tpu.memory_space<vmem>>, vector<16x32xf32>
    %c0_1 = arith.constant 0 : index
    %c0_2 = arith.constant 0 : index
    %1 = vector.load %arg1[%c0_1, %c0_2] : memref<16x32xf32, #tpu.memory_space<vmem>>, vector<16x32xf32>
    %2 = arith.addf %1, %0 : vector<16x32xf32>
    %c0_3 = arith.constant 0 : index
    %c0_4 = arith.constant 0 : index
    %3 = vector.load %arg3[%c0_3, %c0_4] : memref<16x32xf32, #tpu.memory_space<vmem>>, vector<16x32xf32>
    tpu.vector_store %arg3[%c0_3, %c0_4], %2 {strides = array<i32>} : memref<16x32xf32, #tpu.memory_space<vmem>>, vector<16x32xf32>,
    return
  }
  func.func @transform_0(%arg0: i32) -> (i32, i32) {
    %c0_i32 = arith.constant 0 : i32
    %c0_i32_0 = arith.constant 0 : i32
    return %arg0, %c0_i32 : i32, i32
  }
  func.func @transform_1(%arg0: i32) -> (i32, i32) {
    %c0_i32 = arith.constant 0 : i32
    %c0_i32_0 = arith.constant 0 : i32
    return %arg0, %c0_i32 : i32, i32
  }
  func.func @transform_2(%arg0: i32) -> (i32, i32) {
    %c0_i32 = arith.constant 0 : i32
    %c0_i32_0 = arith.constant 0 : i32
    return %arg0, %c0_i32 : i32, i32
  }
}

</mosaic_0001>

<bundles_post_ra>
// kernel: tpu_custom_call.1
= control target key start
LH: loop header
LB: loop body
LE: loop exit
PB: predicated region body
PF: predicated region fallthrough
CT: control target
= control target key end

     0   :  { %7 = vsyncpa [#allocation3], 0  ;;  %s176_s0 = inlined_call_operand.hbm [shape: f32[16,32], index: 0, kind: input, shape index: {}]   ;;  %s177_s1 = inlined_call_operand.hbm [shape: f32[16,32], index: 1, kind: input, shape index: {}]   ;;  %s178_s2 = inlined_call_operand.hbm [shape: f32[16,32], index: 2, kind: output, shape index: {}]  }
   0x1   :  { %8 = vsyncpa [#allocation6], 0 }
   0x2   :  { %9 = vsyncpa [#allocation4], 0  ;;  %s138_s9 = smov [#allocation2]  }
   0x3   :  { %s15_s10 = sshll.u32 %s138_s9, 4  ;;  %s16_s10 = int_to_ptr.vmem [resolvable:$true] %s15_s10 }
   0x4   :  { %s80_s11 = scalar_lea.vmem %s16_s10, 256  ;;  %p85_p1 = scmp.lt.s32.totalorder %s16_s10, %s16_s10 }
   0x5   :  { %p81_p0 = scmp.ne.s32.totalorder %s16_s10, %s80_s11  ;;  %p86_p2 = scmp.lt.s32.totalorder %s80_s11, %s80_s11 }
   0x7   :  { %p87_p3 = por %p86_p2, %p85_p1 }
   0x9   :  { %p88_p4 = pnand %p87_p3, %p81_p0 }
   0xb   :  { %91 = shalt.err (!%p88_p4)
}
   0xc   :  { %s139_s12 = smov 128   ;;  %s140_s13 = smov 8  }
   0xd   :  { %21 = dma.hbm_to_vmem [thread:$0]  %s176_s0, 256, %s16_s10, [#allocation3], %s139_s12, %s139_s12, %s140_s13  }
   0xe   :  { %s141_s16 = smov [#allocation5]  }
   0xf   :  { %s27_s17 = sshll.u32 %s141_s16, 4  ;;  %s28_s17 = int_to_ptr.vmem [resolvable:$true] %s27_s17 }
  0x10   :  { %s100_s18 = scalar_lea.vmem %s28_s17, 256  ;;  %p105_p6 = scmp.lt.s32.totalorder %s28_s17, %s28_s17 }
  0x11   :  { %p101_p5 = scmp.ne.s32.totalorder %s28_s17, %s100_s18  ;;  %p106_p7 = scmp.lt.s32.totalorder %s100_s18, %s100_s18 }
  0x13   :  { %p107_p8 = por %p106_p7, %p105_p6 }
  0x15   :  { %p108_p9 = pnand %p107_p8, %p101_p5 }
  0x17   :  { %111 = shalt.err (!%p108_p9)
}
  0x18   :  { %33 = dma.hbm_to_vmem [thread:$0]  %s177_s1, 256, %s28_s17, [#allocation6], %s139_s12, %s139_s12, %s140_s13  }
  0x19   :  { %132 = dma.done.wait [#allocation3], 256  }
  0x1a   :  { %133 = vsyncadd [#allocation3], 4294967040 }
  0x1b   :  { %134 = dma.done.wait [#allocation6], 256  }
  0x1c   :  { %135 = vsyncadd [#allocation6], 4294967040  ;;  %s142_s0 = smov [#allocation7]   ;;  %v40_v0 = vld [vmem:[#allocation5] sm:$0xff]  ;;  %v42_v1 = vld [vmem:[#allocation2] sm:$0xff]  ;;  %vm46_vm0 = vcmask 261120  }
  0x1d   :  { %s54_s21 = sshll.u32 %s142_s0, 4  ;;  %v41_v2 = vld [vmem:[#allocation5 + $0x8] sm:$0xff]  ;;  %v44_v3 = vadd.f32 %v42_v1, %v40_v0  ;;  %v43_v4 = vld [vmem:[#allocation2 + $0x8] sm:$0xff]  ;;  %s55_s21 = int_to_ptr.vmem [resolvable:$true] %s54_s21 }
  0x1e   :  { %v45_v5 = vadd.f32 %v43_v4, %v41_v2  ;;  %s112_s22 = scalar_lea.vmem %s55_s21, 256  ;;  %p117_p11 = scmp.lt.s32.totalorder %s55_s21, %s55_s21 }
  0x1f   :  { %47 = vst.msk [vmem:[#allocation7] sm:$0xff] %vm46_vm0, %v44_v3  ;;  %p113_p10 = scmp.ne.s32.totalorder %s55_s21, %s112_s22  ;;  %p118_p12 = scmp.lt.s32.totalorder %s112_s22, %s112_s22 }
  0x20   :  { %48 = vst.msk [vmem:[#allocation7 + $0x8] sm:$0xff] %vm46_vm0, %v45_v5 }
  0x21   :  { %p119_p13 = por %p118_p12, %p117_p11 }
  0x23   :  { %p120_p0 = pnand %p119_p13, %p113_p10 }
  0x25   :  { %123 = shalt.err (!%p120_p0)
}
  0x26   :  { %60 = dma.vmem_to_hbm [thread:$0]  %s55_s21, 256, %s178_s2, [#allocation4], %s139_s12, %s139_s12, %s140_s13  }
  0x27   :  { %136 = dma.done.wait [#allocation4], 256  }
  0x28   :  { %137 = vsyncadd [#allocation4], 4294967040 }
  0x29   :  { %64 = vsyncpa [#allocation3], 1 }
  0x2a   :  { %65 = vsyncpa [#allocation6], 1 }
  0x2b   :  { %66 = vsyncpa [#allocation4], 1 }

</bundles_post_ra>
